<compile_context>
chip_gen: v6e
topology: v6e:2x2x1
jax: 0.10.0
libtpu: 0.0.40
codegen_flags: <defaults>
</compile_context>

<pallas_src>
import jax
import jax.numpy as jnp
from jax.experimental import pallas as pl
from jax.experimental.pallas import tpu as pltpu


def _round_up(x, m):
    return (x + m - 1) // m * m


def _vmem_capacity_bytes():
    """Per-TensorCore VMEM capacity; falls back to the smallest (v7x, 64 MiB)."""
    try:
        return int(pltpu.get_tpu_info().vmem_capacity_bytes)
    except Exception:
        return 64 * 1024 * 1024


# ---------------------------------------------------------------------------
# Kernels
# ---------------------------------------------------------------------------
def _mlp_kernel_proj(x_ref, w1r_ref, b1r_ref, w2_ref, b2_ref, o_ref):
    """Fused MLP, residual-projection variant.  w1r = [W1 | Wr]  (n_pad, 2*h_pad)."""
    mm_dtype = w1r_ref.dtype                      # bf16 -> native MXU path
    x = x_ref[...].astype(mm_dtype)
    # One wide matmul yields the fc1 pre-activation (first h_pad lanes) and the
    # residual projection (last h_pad lanes).  f32 accumulation on the MXU.
    hp = jnp.dot(x, w1r_ref[...], preferred_element_type=jnp.float32) + b1r_ref[...]
    H = w2_ref.shape[0]
    h = jnp.maximum(hp[:, :H], 0.0)               # ReLU (dropout = identity, eval)
    res = hp[:, H:]
    out = jnp.dot(h.astype(mm_dtype), w2_ref[...],
                  preferred_element_type=jnp.float32) + b2_ref[...]
    o_ref[...] = (out + res).astype(o_ref.dtype)


def _mlp_kernel_identity(x_ref, w1_ref, b1_ref, w2_ref, b2_ref, o_ref):
    """Fused MLP, identity-residual variant (input_dim == hidden_dim)."""
    mm_dtype = w1_ref.dtype
    x = x_ref[...]
    hp = jnp.dot(x.astype(mm_dtype), w1_ref[...],
                 preferred_element_type=jnp.float32) + b1_ref[...]
    h = jnp.maximum(hp, 0.0)
    out = jnp.dot(h.astype(mm_dtype), w2_ref[...],
                  preferred_element_type=jnp.float32) + b2_ref[...]
    o_ref[...] = (out + x.astype(jnp.float32)).astype(o_ref.dtype)


# ---------------------------------------------------------------------------
# One-time parameter preparation (hoisted out of the per-call forward)
# ---------------------------------------------------------------------------
def prepare_params(params, matmul_dtype=jnp.bfloat16):
    """Pad to 128-lane multiples, fuse [W1|Wr], and cast matmul operands once."""
    in_dim, hid = params["w1"].shape
    n_pad = _round_up(in_dim, 128)
    h_pad = _round_up(hid, 128)
    has_proj = "wr" in params

    def pad_w(w):
        return jnp.zeros((n_pad, h_pad), matmul_dtype).at[:in_dim, :hid].set(
            w.astype(matmul_dtype))

    def pad_w2(w):
        return jnp.zeros((h_pad, h_pad), matmul_dtype).at[:hid, :hid].set(
            w.astype(matmul_dtype))

    def pad_b(b):
        return jnp.zeros((1, h_pad), jnp.float32).at[0, :hid].set(
            b.reshape(-1).astype(jnp.float32))

    w1, b1 = pad_w(params["w1"]), pad_b(params["b1"])
    w2, b2 = pad_w2(params["w2"]), pad_b(params["b2"])

    if has_proj:
        w1r = jnp.concatenate([w1, pad_w(params["wr"])], axis=1)   # (n_pad, 2*h_pad)
        b1r = jnp.concatenate([b1, pad_b(params["br"])], axis=1)
    else:
        w1r, b1r = w1, b1

    return {
        "w1r": w1r, "b1r": b1r, "w2": w2, "b2": b2,
        "input_dim": in_dim, "hidden_dim": hid,
        "n_pad": n_pad, "h_pad": h_pad, "has_proj": has_proj,
        "w_cols": int(w1r.shape[1]),
        "mm_itemsize": jnp.dtype(matmul_dtype).itemsize,
    }


# ---------------------------------------------------------------------------
# Tiling
# ---------------------------------------------------------------------------
def _choose_tile_m(M, n_pad, h_pad, w_cols, x_itemsize, w_itemsize, sub, budget):
    """Largest row tile (multiple of the dtype sublane) fitting the VMEM budget."""
    m_cap = _round_up(max(M, sub), sub)
    # Resident weights/biases: single-buffered (constant block index).
    weights = (n_pad * w_cols + h_pad * h_pad) * w_itemsize + (w_cols + h_pad) * 4
    for cand in (2048, 1024, 512, 256, 128, 64, 32, 16, 8):
        if cand < sub:
            continue
        tm = min(cand, m_cap)
        acts = 2 * tm * (n_pad + h_pad) * x_itemsize             # double-buffered x / out
        inter = tm * (w_cols * 4 + (n_pad + 2 * h_pad) * w_itemsize + h_pad * 8)
        if weights + acts + inter <= budget:
            return tm
    # TODO(synk): hidden-dim-split fallback with a VMEM accumulator for the
    # case where resident weights alone exceed the budget.
    return sub


# ---------------------------------------------------------------------------
# Forward
# ---------------------------------------------------------------------------
def _launch(x2d, prep, tile_m, grid_m, single_buffer_weights, cost, cparams, out_dtype):
    M, n_pad = x2d.shape
    w_cols, h_pad = prep["w_cols"], prep["h_pad"]

    row_spec = lambda cols: pl.BlockSpec((tile_m, cols), lambda i: (i, 0))
    if single_buffer_weights:
        # Constant-index (resident) blocks never change -> one buffer suffices.
        res_spec = lambda shape: pl.BlockSpec(shape, lambda i: (0, 0),
                                              pipeline_mode=pl.Buffered(1))
    else:
        res_spec = lambda shape: pl.BlockSpec(shape, lambda i: (0, 0))

    kernel = _mlp_kernel_proj if prep["has_proj"] else _mlp_kernel_identity
    return pl.pallas_call(
        kernel,
        out_shape=jax.ShapeDtypeStruct((M, h_pad), out_dtype),
        grid=(grid_m,),
        in_specs=[row_spec(n_pad),
                  res_spec((n_pad, w_cols)), res_spec((1, w_cols)),
                  res_spec((h_pad, h_pad)), res_spec((1, h_pad))],
        out_specs=row_spec(h_pad),
        compiler_params=cparams,
        cost_estimate=cost,
    )(x2d, prep["w1r"], prep["b1r"], prep["w2"], prep["b2"])


def mlp_forward(x, prep, tile_m=None):
    """x: [B, D, N] with N == input_dim.  Returns [B, D, hidden_dim]."""
    B, D, N = x.shape
    assert N == prep["input_dim"]
    hid, n_pad, h_pad = prep["hidden_dim"], prep["n_pad"], prep["h_pad"]
    w_cols = prep["w_cols"]
    dtype = x.dtype
    x_itemsize = jnp.dtype(dtype).itemsize
    sub = max(8, 32 // x_itemsize)           # native sublane multiple (8 f32 / 16 bf16)

    M = B * D
    x2d = x.reshape(M, N)
    if N != n_pad:                           # pad lane axis only when ragged
        x2d = jnp.pad(x2d, ((0, 0), (0, n_pad - N)))

    vmem_cap = min(_vmem_capacity_bytes(), 128 * 1024 * 1024)   # per-TensorCore
    if tile_m is None:
        tile_m = _choose_tile_m(M, n_pad, h_pad, w_cols, x_itemsize,
                                prep["mm_itemsize"], sub,
                                budget=int(0.70 * vmem_cap))
    grid_m = pl.cdiv(M, tile_m)              # ragged M -> Pallas edge blocks, no M padding

    flops = 2 * M * n_pad * w_cols + 2 * M * h_pad * h_pad
    bytes_accessed = ((M * n_pad + M * h_pad) * x_itemsize
                      + (n_pad * w_cols + h_pad * h_pad) * prep["mm_itemsize"]
                      + (w_cols + h_pad) * 4)
    cost = pl.CostEstimate(flops=flops, transcendentals=0,
                           bytes_accessed=bytes_accessed)
    cparams = pltpu.CompilerParams(
        dimension_semantics=("parallel",),   # row tiles shard across v7x's 2 TCs
        vmem_limit_bytes=max(32 * 1024 * 1024, int(0.85 * vmem_cap)),
    )

    try:
        out2d = _launch(x2d, prep, tile_m, grid_m, True, cost, cparams, dtype)
    except Exception:
        # pipeline_mode=pl.Buffered(1) not supported here -> default buffering.
        out2d = _launch(x2d, prep, tile_m, grid_m, False, cost, cparams, dtype)

    if hid != h_pad:
        out2d = out2d[:, :hid]
    return out2d.reshape(B, D, hid)


# ---------------------------------------------------------------------------
# Init + pure-JAX reference
# ---------------------------------------------------------------------------
def init_params(key, input_dim, hidden_dim, dtype=jnp.float32):
    """PyTorch-Linear-shaped params, stored transposed ([in, out])."""
    ks = jax.random.split(key, 6)

    def u(k, shape, fan_in):
        bound = 1.0 / jnp.sqrt(fan_in)
        return jax.random.uniform(k, shape, dtype, -bound, bound)

    params = {
        "w1": u(ks[0], (input_dim, hidden_dim), input_dim),
        "b1": u(ks[1], (1, hidden_dim), input_dim),
        "w2": u(ks[2], (hidden_dim, hidden_dim), hidden_dim),
        "b2": u(ks[3], (1, hidden_dim), hidden_dim),
    }
    if input_dim != hidden_dim:
        params["wr"] = u(ks[4], (input_dim, hidden_dim), input_dim)
        params["br"] = u(ks[5], (1, hidden_dim), input_dim)
    return params


def mlp_reference(x, params):
    """Pure-JAX f32 reference of the PyTorch forward (eval mode)."""
    x = x.astype(jnp.float32)
    p = {k: v.astype(jnp.float32) for k, v in params.items()}
    h = jnp.maximum(x @ p["w1"] + p["b1"][0], 0.0)
    out = h @ p["w2"] + p["b2"][0]
    res = (x @ p["wr"] + p["br"][0]) if "wr" in params else x
    return out + res


if __name__ == "__main__":
    key = jax.random.PRNGKey(0)
    k_x1, k_p1, k_x2, k_p2, k_x3, k_p3 = jax.random.split(key, 6)
    # bf16 MXU operands vs. the f32 reference -> tolerance sized for bf16.
    ATOL = RTOL = 5e-2

    # Case 1: residual-projection path (input_dim != hidden_dim), f32 input.
    B, D, input_dim, hidden_dim = 2, 8, 32, 64
    x1 = jax.random.normal(k_x1, (B, D, input_dim), dtype=jnp.float32)
    p1 = init_params(k_p1, input_dim, hidden_dim)
    prep1 = prepare_params(p1)
    out1 = jax.block_until_ready(mlp_forward(x1, prep1))
    ref1 = mlp_reference(x1, p1)
    assert out1.shape == (B, D, hidden_dim)
    assert jnp.allclose(out1.astype(jnp.float32), ref1, atol=ATOL, rtol=RTOL), "proj path mismatch"

    # Case 2: identity-residual path (input_dim == hidden_dim), bf16 input
    # (exercises the 16-row sublane tile rounding).
    x2 = jax.random.normal(k_x2, (B, D, 64), dtype=jnp.float32).astype(jnp.bfloat16)
    p2 = init_params(k_p2, 64, 64)
    prep2 = prepare_params(p2)
    out2 = jax.block_until_ready(mlp_forward(x2, prep2))
    ref2 = mlp_reference(x2, p2)
    assert out2.shape == (B, D, 64)
    assert jnp.allclose(out2.astype(jnp.float32), ref2, atol=ATOL, rtol=RTOL), "identity path mismatch"

    # Case 3: ragged row count (M=200) with an explicit small tile (multi-step
    # grid + partial edge block) and unaligned feature dims (lane padding path).
    B3, D3, in3, hid3 = 2, 100, 48, 96
    x3 = jax.random.normal(k_x3, (B3, D3, in3), dtype=jnp.float32)
    p3 = init_params(k_p3, in3, hid3)
    prep3 = prepare_params(p3)
    out3 = jax.block_until_ready(mlp_forward(x3, prep3, tile_m=64))
    ref3 = mlp_reference(x3, p3)
    assert out3.shape == (B3, D3, hid3)
    assert jnp.allclose(out3.astype(jnp.float32), ref3, atol=ATOL, rtol=RTOL), "ragged-M path mismatch"

    print("KERNEL_OK")
</pallas_src>

<mosaic_0001>
module attributes {stable_mosaic.version = 11 : i64} {
  func.func @_mlp_kernel_proj(%arg0: i32, %arg1: memref<16x128xf32, #tpu.memory_space<vmem>>, %arg2: memref<128x256xbf16, #tpu.memory_space<vmem>>, %arg3: memref<1x256xf32, #tpu.memory_space<vmem>>, %arg4: memref<128x128xbf16, #tpu.memory_space<vmem>>, %arg5: memref<1x128xf32, #tpu.memory_space<vmem>>, %arg6: memref<16x128xf32, #tpu.memory_space<vmem>>) attributes {dimension_semantics = [#tpu.dimension_semantics<parallel>], iteration_bounds = array<i64: 1>, scalar_prefetch = 0 : i64, scratch_operands = 0 : i64, tpu.core_type = #tpu.core_type<tc>, window_params = [{transform_indices = @transform_0, window_bounds = array<i64: 16, 128>}, {pipeline_mode = #tpu.pipeline_mode<synchronous>, transform_indices = @transform_1, window_bounds = array<i64: 128, 256>}, {pipeline_mode = #tpu.pipeline_mode<synchronous>, transform_indices = @transform_2, window_bounds = array<i64: 1, 256>}, {pipeline_mode = #tpu.pipeline_mode<synchronous>, transform_indices = @transform_3, window_bounds = array<i64: 128, 128>}, {pipeline_mode = #tpu.pipeline_mode<synchronous>, transform_indices = @transform_4, window_bounds = array<i64: 1, 128>}, {transform_indices = @transform_5, window_bounds = array<i64: 16, 128>}]} {
    %c0 = arith.constant 0 : index
    %c0_0 = arith.constant 0 : index
    %0 = vector.load %arg1[%c0, %c0_0] : memref<16x128xf32, #tpu.memory_space<vmem>>, vector<16x128xf32>
    %1 = arith.truncf %0 : vector<16x128xf32> to vector<16x128xbf16>
    %c0_1 = arith.constant 0 : index
    %c0_2 = arith.constant 0 : index
    %2 = vector.load %arg2[%c0_1, %c0_2] : memref<128x256xbf16, #tpu.memory_space<vmem>>, vector<128x256xbf16>
    %cst = arith.constant dense<0.000000e+00> : vector<16x256xf32>
    %3 = tpu.matmul %1, %2, %cst {dimension_numbers = #tpu.dot_dimension_numbers<[1], [0], [0], [1], [0, 0, 1, 1], [], []>} : vector<16x128xbf16>, vector<128x256xbf16>, vector<16x256xf32> -> vector<16x256xf32>
    %c0_3 = arith.constant 0 : index
    %c0_4 = arith.constant 0 : index
    %4 = vector.load %arg3[%c0_3, %c0_4] : memref<1x256xf32, #tpu.memory_space<vmem>>, vector<1x256xf32>
    %5 = vector.broadcast %4 : vector<1x256xf32> to vector<16x256xf32>
    %6 = arith.addf %3, %5 : vector<16x256xf32>
    %7 = vector.extract_strided_slice %6 {offsets = [0, 0], sizes = [16, 128], strides = [1, 1]} : vector<16x256xf32> to vector<16x128xf32>
    %cst_5 = arith.constant 0.000000e+00 : f32
    %8 = vector.broadcast %cst_5 : f32 to vector<16x128xf32>
    %9 = arith.maximumf %7, %8 : vector<16x128xf32>
    %10 = vector.extract_strided_slice %6 {offsets = [0, 128], sizes = [16, 128], strides = [1, 1]} : vector<16x256xf32> to vector<16x128xf32>
    %11 = arith.truncf %9 : vector<16x128xf32> to vector<16x128xbf16>
    %c0_6 = arith.constant 0 : index
    %c0_7 = arith.constant 0 : index
    %12 = vector.load %arg4[%c0_6, %c0_7] : memref<128x128xbf16, #tpu.memory_space<vmem>>, vector<128x128xbf16>
    %cst_8 = arith.constant dense<0.000000e+00> : vector<16x128xf32>
    %13 = tpu.matmul %11, %12, %cst_8 {dimension_numbers = #tpu.dot_dimension_numbers<[1], [0], [0], [1], [0, 0, 1, 1], [], []>} : vector<16x128xbf16>, vector<128x128xbf16>, vector<16x128xf32> -> vector<16x128xf32>
    %c0_9 = arith.constant 0 : index
    %c0_10 = arith.constant 0 : index
    %14 = vector.load %arg5[%c0_9, %c0_10] : memref<1x128xf32, #tpu.memory_space<vmem>>, vector<1x128xf32>
    %15 = vector.broadcast %14 : vector<1x128xf32> to vector<16x128xf32>
    %16 = arith.addf %13, %15 : vector<16x128xf32>
    %17 = arith.addf %16, %10 : vector<16x128xf32>
    %c0_11 = arith.constant 0 : index
    %c0_12 = arith.constant 0 : index
    %18 = vector.load %arg6[%c0_11, %c0_12] : memref<16x128xf32, #tpu.memory_space<vmem>>, vector<16x128xf32>
    tpu.vector_store %arg6[%c0_11, %c0_12], %17 {strides = array<i32>} : memref<16x128xf32, #tpu.memory_space<vmem>>, vector<16x128xf32>,
    return
  }
  func.func @transform_0(%arg0: i32) -> (i32, i32) {
    %c0_i32 = arith.constant 0 : i32
    %c0_i32_0 = arith.constant 0 : i32
    return %arg0, %c0_i32 : i32, i32
  }
  func.func @transform_1(%arg0: i32) -> (i32, i32) {
    %c0_i32 = arith.constant 0 : i32
    %c0_i32_0 = arith.constant 0 : i32
    %c0_i32_1 = arith.constant 0 : i32
    return %c0_i32, %c0_i32_0 : i32, i32
  }
  func.func @transform_2(%arg0: i32) -> (i32, i32) {
    %c0_i32 = arith.constant 0 : i32
    %c0_i32_0 = arith.constant 0 : i32
    %c0_i32_1 = arith.constant 0 : i32
    return %c0_i32, %c0_i32_0 : i32, i32
  }
  func.func @transform_3(%arg0: i32) -> (i32, i32) {
    %c0_i32 = arith.constant 0 : i32
    %c0_i32_0 = arith.constant 0 : i32
    %c0_i32_1 = arith.constant 0 : i32
    return %c0_i32, %c0_i32_0 : i32, i32
  }
  func.func @transform_4(%arg0: i32) -> (i32, i32) {
    %c0_i32 = arith.constant 0 : i32
    %c0_i32_0 = arith.constant 0 : i32
    %c0_i32_1 = arith.constant 0 : i32
    return %c0_i32, %c0_i32_0 : i32, i32
  }
  func.func @transform_5(%arg0: i32) -> (i32, i32) {
    %c0_i32 = arith.constant 0 : i32
    %c0_i32_0 = arith.constant 0 : i32
    return %arg0, %c0_i32 : i32, i32
  }
}

module attributes {stable_mosaic.version = 11 : i64} {
  func.func @_mlp_kernel_proj(%arg0: i32, %arg1: memref<16x128xf32, #tpu.memory_space<vmem>>, %arg2: memref<128x256xbf16, #tpu.memory_space<vmem>>, %arg3: memref<1x256xf32, #tpu.memory_space<vmem>>, %arg4: memref<128x128xbf16, #tpu.memory_space<vmem>>, %arg5: memref<1x128xf32, #tpu.memory_space<vmem>>, %arg6: memref<16x128xf32, #tpu.memory_space<vmem>>) attributes {dimension_semantics = [#tpu.dimension_semantics<parallel>], iteration_bounds = array<i64: 1>, scalar_prefetch = 0 : i64, scratch_operands = 0 : i64, tpu.core_type = #tpu.core_type<tc>, window_params = [{transform_indices = @transform_0, window_bounds = array<i64: 16, 128>}, {pipeline_mode = #tpu.pipeline_mode<synchronous>, transform_indices = @transform_1, window_bounds = array<i64: 128, 256>}, {pipeline_mode = #tpu.pipeline_mode<synchronous>, transform_indices = @transform_2, window_bounds = array<i64: 1, 256>}, {pipeline_mode = #tpu.pipeline_mode<synchronous>, transform_indices = @transform_3, window_bounds = array<i64: 128, 128>}, {pipeline_mode = #tpu.pipeline_mode<synchronous>, transform_indices = @transform_4, window_bounds = array<i64: 1, 128>}, {transform_indices = @transform_5, window_bounds = array<i64: 16, 128>}]} {
    %c0 = arith.constant 0 : index
    %c0_0 = arith.constant 0 : index
    %0 = vector.load %arg1[%c0, %c0_0] : memref<16x128xf32, #tpu.memory_space<vmem>>, vector<16x128xf32>
    %1 = arith.truncf %0 : vector<16x128xf32> to vector<16x128xbf16>
    %c0_1 = arith.constant 0 : index
    %c0_2 = arith.constant 0 : index
    %2 = vector.load %arg2[%c0_1, %c0_2] : memref<128x256xbf16, #tpu.memory_space<vmem>>, vector<128x256xbf16>
    %cst = arith.constant dense<0.000000e+00> : vector<16x256xf32>
    %3 = tpu.matmul %1, %2, %cst {dimension_numbers = #tpu.dot_dimension_numbers<[1], [0], [0], [1], [0, 0, 1, 1], [], []>} : vector<16x128xbf16>, vector<128x256xbf16>, vector<16x256xf32> -> vector<16x256xf32>
    %c0_3 = arith.constant 0 : index
    %c0_4 = arith.constant 0 : index
    %4 = vector.load %arg3[%c0_3, %c0_4] : memref<1x256xf32, #tpu.memory_space<vmem>>, vector<1x256xf32>
    %5 = vector.broadcast %4 : vector<1x256xf32> to vector<16x256xf32>
    %6 = arith.addf %3, %5 : vector<16x256xf32>
    %7 = vector.extract_strided_slice %6 {offsets = [0, 0], sizes = [16, 128], strides = [1, 1]} : vector<16x256xf32> to vector<16x128xf32>
    %cst_5 = arith.constant 0.000000e+00 : f32
    %8 = vector.broadcast %cst_5 : f32 to vector<16x128xf32>
    %9 = arith.maximumf %7, %8 : vector<16x128xf32>
    %10 = vector.extract_strided_slice %6 {offsets = [0, 128], sizes = [16, 128], strides = [1, 1]} : vector<16x256xf32> to vector<16x128xf32>
    %11 = arith.truncf %9 : vector<16x128xf32> to vector<16x128xbf16>
    %c0_6 = arith.constant 0 : index
    %c0_7 = arith.constant 0 : index
    %12 = vector.load %arg4[%c0_6, %c0_7] : memref<128x128xbf16, #tpu.memory_space<vmem>>, vector<128x128xbf16>
    %cst_8 = arith.constant dense<0.000000e+00> : vector<16x128xf32>
    %13 = tpu.matmul %11, %12, %cst_8 {dimension_numbers = #tpu.dot_dimension_numbers<[1], [0], [0], [1], [0, 0, 1, 1], [], []>} : vector<16x128xbf16>, vector<128x128xbf16>, vector<16x128xf32> -> vector<16x128xf32>
    %c0_9 = arith.constant 0 : index
    %c0_10 = arith.constant 0 : index
    %14 = vector.load %arg5[%c0_9, %c0_10] : memref<1x128xf32, #tpu.memory_space<vmem>>, vector<1x128xf32>
    %15 = vector.broadcast %14 : vector<1x128xf32> to vector<16x128xf32>
    %16 = arith.addf %13, %15 : vector<16x128xf32>
    %17 = arith.addf %16, %10 : vector<16x128xf32>
    %c0_11 = arith.constant 0 : index
    %c0_12 = arith.constant 0 : index
    %18 = vector.load %arg6[%c0_11, %c0_12] : memref<16x128xf32, #tpu.memory_space<vmem>>, vector<16x128xf32>
    tpu.vector_store %arg6[%c0_11, %c0_12], %17 {strides = array<i32>} : memref<16x128xf32, #tpu.memory_space<vmem>>, vector<16x128xf32>,
    return
  }
  func.func @transform_0(%arg0: i32) -> (i32, i32) {
    %c0_i32 = arith.constant 0 : i32
    %c0_i32_0 = arith.constant 0 : i32
    return %arg0, %c0_i32 : i32, i32
  }
  func.func @transform_1(%arg0: i32) -> (i32, i32) {
    %c0_i32 = arith.constant 0 : i32
    %c0_i32_0 = arith.constant 0 : i32
    %c0_i32_1 = arith.constant 0 : i32
    return %c0_i32, %c0_i32_0 : i32, i32
  }
  func.func @transform_2(%arg0: i32) -> (i32, i32) {
    %c0_i32 = arith.constant 0 : i32
    %c0_i32_0 = arith.constant 0 : i32
    %c0_i32_1 = arith.constant 0 : i32
    return %c0_i32, %c0_i32_0 : i32, i32
  }
  func.func @transform_3(%arg0: i32) -> (i32, i32) {
    %c0_i32 = arith.constant 0 : i32
    %c0_i32_0 = arith.constant 0 : i32
    %c0_i32_1 = arith.constant 0 : i32
    return %c0_i32, %c0_i32_0 : i32, i32
  }
  func.func @transform_4(%arg0: i32) -> (i32, i32) {
    %c0_i32 = arith.constant 0 : i32
    %c0_i32_0 = arith.constant 0 : i32
    %c0_i32_1 = arith.constant 0 : i32
    return %c0_i32, %c0_i32_0 : i32, i32
  }
  func.func @transform_5(%arg0: i32) -> (i32, i32) {
    %c0_i32 = arith.constant 0 : i32
    %c0_i32_0 = arith.constant 0 : i32
    return %arg0, %c0_i32 : i32, i32
  }
}

</mosaic_0001>

<bundles_post_ra>
// kernel: tpu_custom_call.1
= control target key start
LH: loop header
LB: loop body
LE: loop exit
PB: predicated region body
PF: predicated region fallthrough
CT: control target
= control target key end

     0   :  { %10 = vsyncpa [#allocation3], 0  ;;  %s605_s0 = inlined_call_operand.hbm [shape: f32[16,128], index: 0, kind: input, shape index: {}]   ;;  %s606_s1 = inlined_call_operand.hbm [shape: bf16[128,256], index: 1, kind: input, shape index: {}]   ;;  %s607_s2 = inlined_call_operand.vmem [shape: f32[1,256], index: 2, kind: input, shape index: {}]   ;;  %s608_s3 = inlined_call_operand.hbm [shape: bf16[128,128], index: 3, kind: input, shape index: {}]   ;;  %s609_s4 = inlined_call_operand.vmem [shape: f32[1,128], index: 4, kind: input, shape index: {}]   ;;  %s610_s5 = inlined_call_operand.hbm [shape: f32[16,128], index: 5, kind: output, shape index: {}]  }
   0x1   :  { %11 = vsyncpa [#allocation6], 0 }
   0x2   :  { %12 = vsyncpa [#allocation4], 0  ;;  %s537_s18 = smov [#allocation5]   ;;  %s538_s20 = smov [#allocation2]  }
   0x3   :  { %s30_s19 = sshll.u32 %s537_s18, 4  ;;  %s18_s21 = sshll.u32 %s538_s20, 4  ;;  %s31_s19 = int_to_ptr.vmem [resolvable:$true] %s30_s19  ;;  %s19_s21 = int_to_ptr.vmem [resolvable:$true] %s18_s21 }
   0x4   :  { %s459_s22 = scalar_lea.vmem %s31_s19, 2048  ;;  %p464_p1 = scmp.lt.s32.totalorder %s31_s19, %s31_s19 }
   0x5   :  { %p460_p0 = scmp.ne.s32.totalorder %s31_s19, %s459_s22  ;;  %p465_p2 = scmp.lt.s32.totalorder %s459_s22, %s459_s22 }
   0x7   :  { %p466_p3 = por %p465_p2, %p464_p1 }
   0x9   :  { %p467_p4 = pnand %p466_p3, %p460_p0 }
   0xb   :  { %470 = shalt.err (!%p467_p4)
}
   0xc   :  { %s539_s23 = smov 128   ;;  %s540_s24 = smov 8  }
   0xd   :  { %36 = dma.hbm_to_vmem [thread:$0]  %s606_s1, 2048, %s31_s19, [#allocation6], %s539_s23, %s539_s23, %s540_s24  }
   0xe   :  { %s479_s27 = scalar_lea.vmem %s19_s21, 256  ;;  %p484_p6 = scmp.lt.s32.totalorder %s19_s21, %s19_s21 }
   0xf   :  { %p480_p5 = scmp.ne.s32.totalorder %s19_s21, %s479_s27  ;;  %p485_p7 = scmp.lt.s32.totalorder %s479_s27, %s479_s27 }
  0x11   :  { %p486_p8 = por %p485_p7, %p484_p6 }
  0x13   :  { %p487_p9 = pnand %p486_p8, %p480_p5 }
  0x15   :  { %490 = shalt.err (!%p487_p9)
}
  0x16   :  { %24 = dma.hbm_to_vmem [thread:$0]  %s605_s0, 256, %s19_s21, [#allocation3], %s539_s23, %s539_s23, %s540_s24  }
  0x17   :  { %s541_s30 = smov [#allocation7]  }
  0x18   :  { %s44_s6 = sshll.u32 %s541_s30, 4  ;;  %s45_s6 = int_to_ptr.vmem [resolvable:$true] %s44_s6 }
  0x19   :  { %s499_s7 = scalar_lea.vmem %s45_s6, 1024  ;;  %p504_p11 = scmp.lt.s32.totalorder %s45_s6, %s45_s6 }
  0x1a   :  { %p500_p10 = scmp.ne.s32.totalorder %s45_s6, %s499_s7  ;;  %p505_p12 = scmp.lt.s32.totalorder %s499_s7, %s499_s7 }
  0x1c   :  { %p506_p13 = por %p505_p12, %p504_p11 }
  0x1e   :  { %p507_p0 = pnand %p506_p13, %p500_p10 }
  0x20   :  { %510 = shalt.err (!%p507_p0)
}
  0x21   :  { %s542_s1 = smov 64   ;;  %s543_s8 = smov 4  }
  0x22   :  { %50 = dma.hbm_to_vmem [thread:$0]  %s608_s3, 1024, %s45_s6, [#allocation6], %s542_s1, %s542_s1, %s543_s8  }
  0x23   :  { %531 = dma.done.wait [#allocation3], 256  }
  0x24   :  { %532 = vsyncadd [#allocation3], 4294967040 }
  0x25   :  { %533 = dma.done.wait [#allocation6], 3072  }
  0x26   :  { %534 = vsyncadd [#allocation6], 4294964224  ;;  %v544_v0 = vmov 0   ;;  %v545_v1 = vmov 0.0   ;;  %v419_v2 = vld [vmem:[#allocation5 + $0x74] ss:$8 sps:$4 sm:$0xff]   ;;  %v84_v29 = vlaneseq }
  0x27   :  { %206 = vmatprep.mubr.bf16.mxu0 %v544_v0  ;;  %388 = vmatprep.subr.bf16.mxu1 %v545_v1  ;;  %v421_v3 = vld [vmem:[#allocation5 + $0x70] ss:$8 sps:$4 sm:$0xff]   ;;  %v422_v4 = vld [vmem:[#allocation5 + $0x64] ss:$8 sps:$4 sm:$0xff]   ;;  %v424_v5 = vld [vmem:[#allocation5 + $0x60] ss:$8 sps:$4 sm:$0xff]  }
  0x28   :  { %174 = vmatprep.subr.bf16.mxu0 %v419_v2  ;;  %v425_v6 = vld [vmem:[#allocation5 + $0x54] ss:$8 sps:$4 sm:$0xff]   ;;  %v427_v7 = vld [vmem:[#allocation5 + $0x50] ss:$8 sps:$4 sm:$0xff]   ;;  %v428_v8 = vld [vmem:[#allocation5 + $0x44] ss:$8 sps:$4 sm:$0xff]  }
  0x29   :  { %175 = vmatpush1.bf16.msra.mxu0 %v421_v3  ;;  %v430_v9 = vld [vmem:[#allocation5 + $0x40] ss:$8 sps:$4 sm:$0xff]   ;;  %v431_v10 = vld [vmem:[#allocation5 + $0x34] ss:$8 sps:$4 sm:$0xff]   ;;  %v433_v13 = vld [vmem:[#allocation5 + $0x30] ss:$8 sps:$4 sm:$0xff]  }
  0x2a   :  { %176 = vmatprep.subr.bf16.mxu0 %v422_v4  ;;  %v443_v11 = vld [vmem:[#allocation7 + $0x38] sm:$0xff]   ;;  %v444_v12 = vld [vmem:[#allocation7 + $0x30] sm:$0xff]   ;;  %v434_v14 = vld [vmem:[#allocation5 + $0x24] ss:$8 sps:$4 sm:$0xff]   ;;  %vm546_vm0 = vmmov 0   ;;  %v85_v30 = vshrl.u32 %v84_v29, 7 }
  0x2b   :  { %389 = vmatpush3.bf16.msra.mxu1 %v443_v11  ;;  %v445_v15 = vld [vmem:[#allocation7 + $0x28] sm:$0xff]   ;;  %v437_v17 = vld [vmem:[#allocation5 + $0x14] ss:$8 sps:$4 sm:$0xff]   ;;  %v446_v18 = vld [vmem:[#allocation7 + $0x20] sm:$0xff]   ;;  %404 = vmatprep.mubr.msk.bf16.mxu1 %vm546_vm0, %v545_v1 }
  0x2c   :  { %390 = vmatprep.subr.bf16.mxu1 %v545_v1  ;;  %v436_v16 = vld [vmem:[#allocation5 + $0x20] ss:$8 sps:$4 sm:$0xff]   ;;  %v439_v19 = vld [vmem:[#allocation5 + $0x10] ss:$8 sps:$4 sm:$0xff]   ;;  %v440_v20 = vld [vmem:[#allocation5 + $0x4] ss:$8 sps:$4 sm:$0xff]  }
  0x2d   :  { %177 = vmatpush1.bf16.msra.mxu0 %v424_v5  ;;  %v447_v21 = vld [vmem:[#allocation7 + $0x18] sm:$0xff]   ;;  %v442_v22 = vld [vmem:[#allocation5] ss:$8 sps:$4 sm:$0xff]   ;;  %v63_v23 = vld [vmem:[#allocation2] sm:$0xff]  ;;  %v86_v31 = vsub.s32 0, %v85_v30  ;;  %v90_v42 = vsub.s32 1, %v85_v30 }
  0x2e   :  { %178 = vmatprep.subr.bf16.mxu0 %v425_v6  ;;  %v64_v24 = vld [vmem:[#allocation2 + $0x8] sm:$0xff]  ;;  %v448_v26 = vld [vmem:[#allocation7 + $0x10] sm:$0xff]   ;;  %v449_v27 = vld [vmem:[#allocation7 + $0x8] sm:$0xff]  }
  0x2f   :  { %391 = vmatpush3.bf16.msra.mxu1 %v444_v12  ;;  %v65_v25 = vpack.c.bf16 %v64_v24, %v63_v23  ;;  %v450_v28 = vld [vmem:[#allocation7] sm:$0xff]   ;;  %v82_v32 = vld [vmem:[%s607_s2] sm:$0x3]  ;;  %s547_s2 = smov [#allocation8]  }
  0x30   :  { %392 = vmatprep.subr.bf16.mxu1 %v545_v1  ;;  %v87_v33 = vrot.slane %v82_v32, %v86_v31  ;;  %v91_v43 = vrot.slane %v82_v32, %v90_v42  ;;  %v370_v44 = vld [vmem:[%s609_s4] ss:$0 sm:$0xff]  ;;  %s341_s13 = sshll.u32 %s547_s2, 4  ;;  %s342_s13 = int_to_ptr.vmem [resolvable:$true] %s341_s13 }
  0x31   :  { %179 = vmatpush1.bf16.msra.mxu0 %v427_v7  ;;  %s511_s14 = scalar_lea.vmem %s342_s13, 256  ;;  %p516_p2 = scmp.lt.s32.totalorder %s342_s13, %s342_s13 }
  0x32   :  { %180 = vmatprep.subr.bf16.mxu0 %v428_v8  ;;  %p512_p1 = scmp.ne.s32.totalorder %s342_s13, %s511_s14  ;;  %p517_p3 = scmp.lt.s32.totalorder %s511_s14, %s511_s14 }
  0x33   :  { %393 = vmatpush3.bf16.msra.mxu1 %v445_v15 }
  0x34   :  { %394 = vmatprep.subr.bf16.mxu1 %v545_v1  ;;  %p518_p4 = por %p517_p3, %p516_p2 }
  0x35   :  { %181 = vmatpush1.bf16.msra.mxu0 %v430_v9 }
  0x36   :  { %182 = vmatprep.subr.bf16.mxu0 %v431_v10  ;;  %p519_p5 = pnand %p518_p4, %p512_p1 }
  0x37   :  { %395 = vmatpush3.bf16.msra.mxu1 %v446_v18 }
  0x38   :  { %396 = vmatprep.subr.bf16.mxu1 %v545_v1 }
  0x39   :  { %183 = vmatpush1.bf16.msra.mxu0 %v433_v13 }
  0x3a   :  { %184 = vmatprep.subr.bf16.mxu0 %v434_v14 }
  0x3b   :  { %397 = vmatpush3.bf16.msra.mxu1 %v447_v21 }
  0x3c   :  { %398 = vmatprep.subr.bf16.mxu1 %v545_v1 }
  0x3d   :  { %185 = vmatpush1.bf16.msra.mxu0 %v436_v16 }
  0x3e   :  { %186 = vmatprep.subr.bf16.mxu0 %v437_v17 }
  0x3f   :  { %399 = vmatpush3.bf16.msra.mxu1 %v448_v26 }
  0x40   :  { %400 = vmatprep.subr.bf16.mxu1 %v545_v1 }
  0x41   :  { %187 = vmatpush1.bf16.msra.mxu0 %v439_v19 }
  0x42   :  { %188 = vmatprep.subr.bf16.mxu0 %v440_v20 }
  0x43   :  { %401 = vmatpush3.bf16.msra.mxu1 %v449_v27 }
  0x44   :  { %402 = vmatprep.subr.bf16.mxu1 %v545_v1 }
  0x45   :  { %189 = vmatpush1.bf16.msra.mxu0 %v442_v22 }
  0x47   :  { %403 = vmatpush3.bf16.msra.mxu1 %v450_v28 }
  0x48   :  { %207 = vmatmul.mubr.bf16.vlgmr.msra.gmra.mxu0 %v65_v25 }
 0x108   :  { %v208_v34 = vpop.f32.mrf.mxu0 }
 0x109   :  { %v209_v36 = vadd.f32 %v208_v34, %v87_v33 }
 0x10a   :  { %v210_v35 = vpop.f32.mrf.mxu0 }
 0x10b   :  { %v217_v39 = vmax.f32 %v209_v36, 0.0  ;;  %v211_v46 = vadd.f32 %v210_v35, %v91_v43 }
 0x10c   :  { %v212_v37 = vpop.f32.mrf.mxu0 }
 0x10d   :  { %v213_v38 = vadd.f32 %v212_v37, %v87_v33 }
 0x10e   :  { %v214_v48 = vpop.f32.mrf.mxu0 }
 0x10f   :  { %v218_v40 = vmax.f32 %v213_v38, 0.0  ;;  %v215_v52 = vadd.f32 %v214_v48, %v91_v43 }
 0x111   :  { %v219_v41 = vpack.c.bf16 %v218_v40, %v217_v39 }
 0x113   :  { %405 = vmatmul.mubr.bf16.vlgmr.msra.gmra.mxu1 %v219_v41 }
 0x1d3   :  { %v325_v45 = vpop.f32.mrf.mxu1 }
 0x1d4   :  { %v326_v47 = vadd.f32 %v370_v44, %v325_v45 }
 0x1d5   :  { %v406_v49 = vpop.f32.mrf.mxu1 }
 0x1d6   :  { %v332_v50 = vadd.f32 %v326_v47, %v211_v46 }
 0x1d7   :  { %v328_v51 = vpop.f32.mrf.mxu1 }
 0x1d8   :  { %334 = vst [vmem:[#allocation8] sm:$0xff] %v332_v50  ;;  %v329_v53 = vadd.f32 %v370_v44, %v328_v51 }
 0x1d9   :  { %v407_v54 = vpop.f32.mrf.mxu1 }
 0x1da   :  { %v333_v55 = vadd.f32 %v329_v53, %v215_v52 }
 0x1dc   :  { %335 = vst [vmem:[#allocation8 + $0x8] sm:$0xff] %v333_v55 }
 0x1dd   :  { %522 = shalt.err (!%p519_p5)
}
 0x1de   :  { %347 = dma.vmem_to_hbm [thread:$0]  %s342_s13, 256, %s610_s5, [#allocation4], %s539_s23, %s539_s23, %s540_s24  }
 0x1df   :  { %535 = dma.done.wait [#allocation4], 256  }
 0x1e0   :  { %536 = vsyncadd [#allocation4], 4294967040 }
 0x1e1   :  { %351 = vsyncpa [#allocation3], 1 }
 0x1e2   :  { %352 = vsyncpa [#allocation6], 1 }
 0x1e3   :  { %353 = vsyncpa [#allocation4], 1 }

// kernel: tpu_custom_call.1
= control target key start
LH: loop header
LB: loop body
LE: loop exit
PB: predicated region body
PF: predicated region fallthrough
CT: control target
= control target key end

     0   :  { %10 = vsyncpa [#allocation3], 0  ;;  %s605_s0 = inlined_call_operand.hbm [shape: f32[16,128], index: 0, kind: input, shape index: {}]   ;;  %s606_s1 = inlined_call_operand.hbm [shape: bf16[128,256], index: 1, kind: input, shape index: {}]   ;;  %s607_s2 = inlined_call_operand.vmem [shape: f32[1,256], index: 2, kind: input, shape index: {}]   ;;  %s608_s3 = inlined_call_operand.hbm [shape: bf16[128,128], index: 3, kind: input, shape index: {}]   ;;  %s609_s4 = inlined_call_operand.vmem [shape: f32[1,128], index: 4, kind: input, shape index: {}]   ;;  %s610_s5 = inlined_call_operand.hbm [shape: f32[16,128], index: 5, kind: output, shape index: {}]  }
   0x1   :  { %11 = vsyncpa [#allocation6], 0 }
   0x2   :  { %12 = vsyncpa [#allocation4], 0  ;;  %s537_s18 = smov [#allocation5]   ;;  %s538_s20 = smov [#allocation2]  }
   0x3   :  { %s30_s19 = sshll.u32 %s537_s18, 4  ;;  %s18_s21 = sshll.u32 %s538_s20, 4  ;;  %s31_s19 = int_to_ptr.vmem [resolvable:$true] %s30_s19  ;;  %s19_s21 = int_to_ptr.vmem [resolvable:$true] %s18_s21 }
   0x4   :  { %s459_s22 = scalar_lea.vmem %s31_s19, 2048  ;;  %p464_p1 = scmp.lt.s32.totalorder %s31_s19, %s31_s19 }
   0x5   :  { %p460_p0 = scmp.ne.s32.totalorder %s31_s19, %s459_s22  ;;  %p465_p2 = scmp.lt.s32.totalorder %s459_s22, %s459_s22 }
   0x7   :  { %p466_p3 = por %p465_p2, %p464_p1 }
   0x9   :  { %p467_p4 = pnand %p466_p3, %p460_p0 }
   0xb   :  { %470 = shalt.err (!%p467_p4)
}
   0xc   :  { %s539_s23 = smov 128   ;;  %s540_s24 = smov 8  }
   0xd   :  { %36 = dma.hbm_to_vmem [thread:$0]  %s606_s1, 2048, %s31_s19, [#allocation6], %s539_s23, %s539_s23, %s540_s24  }
   0xe   :  { %s479_s27 = scalar_lea.vmem %s19_s21, 256  ;;  %p484_p6 = scmp.lt.s32.totalorder %s19_s21, %s19_s21 }
   0xf   :  { %p480_p5 = scmp.ne.s32.totalorder %s19_s21, %s479_s27  ;;  %p485_p7 = scmp.lt.s32.totalorder %s479_s27, %s479_s27 }
  0x11   :  { %p486_p8 = por %p485_p7, %p484_p6 }
  0x13   :  { %p487_p9 = pnand %p486_p8, %p480_p5 }
  0x15   :  { %490 = shalt.err (!%p487_p9)
}
  0x16   :  { %24 = dma.hbm_to_vmem [thread:$0]  %s605_s0, 256, %s19_s21, [#allocation3], %s539_s23, %s539_s23, %s540_s24  }
  0x17   :  { %s541_s30 = smov [#allocation7]  }
  0x18   :  { %s44_s6 = sshll.u32 %s541_s30, 4  ;;  %s45_s6 = int_to_ptr.vmem [resolvable:$true] %s44_s6 }
  0x19   :  { %s499_s7 = scalar_lea.vmem %s45_s6, 1024  ;;  %p504_p11 = scmp.lt.s32.totalorder %s45_s6, %s45_s6 }
  0x1a   :  { %p500_p10 = scmp.ne.s32.totalorder %s45_s6, %s499_s7  ;;  %p505_p12 = scmp.lt.s32.totalorder %s499_s7, %s499_s7 }
  0x1c   :  { %p506_p13 = por %p505_p12, %p504_p11 }
  0x1e   :  { %p507_p0 = pnand %p506_p13, %p500_p10 }
  0x20   :  { %510 = shalt.err (!%p507_p0)
}
  0x21   :  { %s542_s1 = smov 64   ;;  %s543_s8 = smov 4  }
  0x22   :  { %50 = dma.hbm_to_vmem [thread:$0]  %s608_s3, 1024, %s45_s6, [#allocation6], %s542_s1, %s542_s1, %s543_s8  }
  0x23   :  { %531 = dma.done.wait [#allocation3], 256  }
  0x24   :  { %532 = vsyncadd [#allocation3], 4294967040 }
  0x25   :  { %533 = dma.done.wait [#allocation6], 3072  }
  0x26   :  { %534 = vsyncadd [#allocation6], 4294964224  ;;  %v544_v0 = vmov 0   ;;  %v545_v1 = vmov 0.0   ;;  %v419_v2 = vld [vmem:[#allocation5 + $0x74] ss:$8 sps:$4 sm:$0xff]   ;;  %v84_v29 = vlaneseq }
  0x27   :  { %206 = vmatprep.mubr.bf16.mxu0 %v544_v0  ;;  %388 = vmatprep.subr.bf16.mxu1 %v545_v1  ;;  %v421_v3 = vld [vmem:[#allocation5 + $0x70] ss:$8 sps:$4 sm:$0xff]   ;;  %v422_v4 = vld [vmem:[#allocation5 + $0x64] ss:$8 sps:$4 sm:$0xff]   ;;  %v424_v5 = vld [vmem:[#allocation5 + $0x60] ss:$8 sps:$4 sm:$0xff]  }
  0x28   :  { %174 = vmatprep.subr.bf16.mxu0 %v419_v2  ;;  %v425_v6 = vld [vmem:[#allocation5 + $0x54] ss:$8 sps:$4 sm:$0xff]   ;;  %v427_v7 = vld [vmem:[#allocation5 + $0x50] ss:$8 sps:$4 sm:$0xff]   ;;  %v428_v8 = vld [vmem:[#allocation5 + $0x44] ss:$8 sps:$4 sm:$0xff]  }
  0x29   :  { %175 = vmatpush1.bf16.msra.mxu0 %v421_v3  ;;  %v430_v9 = vld [vmem:[#allocation5 + $0x40] ss:$8 sps:$4 sm:$0xff]   ;;  %v431_v10 = vld [vmem:[#allocation5 + $0x34] ss:$8 sps:$4 sm:$0xff]   ;;  %v433_v13 = vld [vmem:[#allocation5 + $0x30] ss:$8 sps:$4 sm:$0xff]  }
  0x2a   :  { %176 = vmatprep.subr.bf16.mxu0 %v422_v4  ;;  %v443_v11 = vld [vmem:[#allocation7 + $0x38] sm:$0xff]   ;;  %v444_v12 = vld [vmem:[#allocation7 + $0x30] sm:$0xff]   ;;  %v434_v14 = vld [vmem:[#allocation5 + $0x24] ss:$8 sps:$4 sm:$0xff]   ;;  %vm546_vm0 = vmmov 0   ;;  %v85_v30 = vshrl.u32 %v84_v29, 7 }
  0x2b   :  { %389 = vmatpush3.bf16.msra.mxu1 %v443_v11  ;;  %v445_v15 = vld [vmem:[#allocation7 + $0x28] sm:$0xff]   ;;  %v437_v17 = vld [vmem:[#allocation5 + $0x14] ss:$8 sps:$4 sm:$0xff]   ;;  %v446_v18 = vld [vmem:[#allocation7 + $0x20] sm:$0xff]   ;;  %404 = vmatprep.mubr.msk.bf16.mxu1 %vm546_vm0, %v545_v1 }
  0x2c   :  { %390 = vmatprep.subr.bf16.mxu1 %v545_v1  ;;  %v436_v16 = vld [vmem:[#allocation5 + $0x20] ss:$8 sps:$4 sm:$0xff]   ;;  %v439_v19 = vld [vmem:[#allocation5 + $0x10] ss:$8 sps:$4 sm:$0xff]   ;;  %v440_v20 = vld [vmem:[#allocation5 + $0x4] ss:$8 sps:$4 sm:$0xff]  }
  0x2d   :  { %177 = vmatpush1.bf16.msra.mxu0 %v424_v5  ;;  %v447_v21 = vld [vmem:[#allocation7 + $0x18] sm:$0xff]   ;;  %v442_v22 = vld [vmem:[#allocation5] ss:$8 sps:$4 sm:$0xff]   ;;  %v63_v23 = vld [vmem:[#allocation2] sm:$0xff]  ;;  %v86_v31 = vsub.s32 0, %v85_v30  ;;  %v90_v42 = vsub.s32 1, %v85_v30 }
  0x2e   :  { %178 = vmatprep.subr.bf16.mxu0 %v425_v6  ;;  %v64_v24 = vld [vmem:[#allocation2 + $0x8] sm:$0xff]  ;;  %v448_v26 = vld [vmem:[#allocation7 + $0x10] sm:$0xff]   ;;  %v449_v27 = vld [vmem:[#allocation7 + $0x8] sm:$0xff]  }
  0x2f   :  { %391 = vmatpush3.bf16.msra.mxu1 %v444_v12  ;;  %v65_v25 = vpack.c.bf16 %v64_v24, %v63_v23  ;;  %v450_v28 = vld [vmem:[#allocation7] sm:$0xff]   ;;  %v82_v32 = vld [vmem:[%s607_s2] sm:$0x3]  ;;  %s547_s2 = smov [#allocation8]  }
  0x30   :  { %392 = vmatprep.subr.bf16.mxu1 %v545_v1  ;;  %v87_v33 = vrot.slane %v82_v32, %v86_v31  ;;  %v91_v43 = vrot.slane %v82_v32, %v90_v42  ;;  %v370_v44 = vld [vmem:[%s609_s4] ss:$0 sm:$0xff]  ;;  %s341_s13 = sshll.u32 %s547_s2, 4  ;;  %s342_s13 = int_to_ptr.vmem [resolvable:$true] %s341_s13 }
  0x31   :  { %179 = vmatpush1.bf16.msra.mxu0 %v427_v7  ;;  %s511_s14 = scalar_lea.vmem %s342_s13, 256  ;;  %p516_p2 = scmp.lt.s32.totalorder %s342_s13, %s342_s13 }
  0x32   :  { %180 = vmatprep.subr.bf16.mxu0 %v428_v8  ;;  %p512_p1 = scmp.ne.s32.totalorder %s342_s13, %s511_s14  ;;  %p517_p3 = scmp.lt.s32.totalorder %s511_s14, %s511_s14 }
  0x33   :  { %393 = vmatpush3.bf16.msra.mxu1 %v445_v15 }
  0x34   :  { %394 = vmatprep.subr.bf16.mxu1 %v545_v1  ;;  %p518_p4 = por %p517_p3, %p516_p2 }
  0x35   :  { %181 = vmatpush1.bf16.msra.mxu0 %v430_v9 }
  0x36   :  { %182 = vmatprep.subr.bf16.mxu0 %v431_v10  ;;  %p519_p5 = pnand %p518_p4, %p512_p1 }
  0x37   :  { %395 = vmatpush3.bf16.msra.mxu1 %v446_v18 }
  0x38   :  { %396 = vmatprep.subr.bf16.mxu1 %v545_v1 }
  0x39   :  { %183 = vmatpush1.bf16.msra.mxu0 %v433_v13 }
  0x3a   :  { %184 = vmatprep.subr.bf16.mxu0 %v434_v14 }
  0x3b   :  { %397 = vmatpush3.bf16.msra.mxu1 %v447_v21 }
  0x3c   :  { %398 = vmatprep.subr.bf16.mxu1 %v545_v1 }
  0x3d   :  { %185 = vmatpush1.bf16.msra.mxu0 %v436_v16 }
  0x3e   :  { %186 = vmatprep.subr.bf16.mxu0 %v437_v17 }
  0x3f   :  { %399 = vmatpush3.bf16.msra.mxu1 %v448_v26 }
  0x40   :  { %400 = vmatprep.subr.bf16.mxu1 %v545_v1 }
  0x41   :  { %187 = vmatpush1.bf16.msra.mxu0 %v439_v19 }
  0x42   :  { %188 = vmatprep.subr.bf16.mxu0 %v440_v20 }
  0x43   :  { %401 = vmatpush3.bf16.msra.mxu1 %v449_v27 }
  0x44   :  { %402 = vmatprep.subr.bf16.mxu1 %v545_v1 }
  0x45   :  { %189 = vmatpush1.bf16.msra.mxu0 %v442_v22 }
  0x47   :  { %403 = vmatpush3.bf16.msra.mxu1 %v450_v28 }
  0x48   :  { %207 = vmatmul.mubr.bf16.vlgmr.msra.gmra.mxu0 %v65_v25 }
 0x108   :  { %v208_v34 = vpop.f32.mrf.mxu0 }
 0x109   :  { %v209_v36 = vadd.f32 %v208_v34, %v87_v33 }
 0x10a   :  { %v210_v35 = vpop.f32.mrf.mxu0 }
 0x10b   :  { %v217_v39 = vmax.f32 %v209_v36, 0.0  ;;  %v211_v46 = vadd.f32 %v210_v35, %v91_v43 }
 0x10c   :  { %v212_v37 = vpop.f32.mrf.mxu0 }
 0x10d   :  { %v213_v38 = vadd.f32 %v212_v37, %v87_v33 }
 0x10e   :  { %v214_v48 = vpop.f32.mrf.mxu0 }
 0x10f   :  { %v218_v40 = vmax.f32 %v213_v38, 0.0  ;;  %v215_v52 = vadd.f32 %v214_v48, %v91_v43 }
 0x111   :  { %v219_v41 = vpack.c.bf16 %v218_v40, %v217_v39 }
 0x113   :  { %405 = vmatmul.mubr.bf16.vlgmr.msra.gmra.mxu1 %v219_v41 }
 0x1d3   :  { %v325_v45 = vpop.f32.mrf.mxu1 }
 0x1d4   :  { %v326_v47 = vadd.f32 %v370_v44, %v325_v45 }
 0x1d5   :  { %v406_v49 = vpop.f32.mrf.mxu1 }
 0x1d6   :  { %v332_v50 = vadd.f32 %v326_v47, %v211_v46 }
 0x1d7   :  { %v328_v51 = vpop.f32.mrf.mxu1 }
 0x1d8   :  { %334 = vst [vmem:[#allocation8] sm:$0xff] %v332_v50  ;;  %v329_v53 = vadd.f32 %v370_v44, %v328_v51 }
 0x1d9   :  { %v407_v54 = vpop.f32.mrf.mxu1 }
 0x1da   :  { %v333_v55 = vadd.f32 %v329_v53, %v215_v52 }
 0x1dc   :  { %335 = vst [vmem:[#allocation8 + $0x8] sm:$0xff] %v333_v55 }
 0x1dd   :  { %522 = shalt.err (!%p519_p5)
}
 0x1de   :  { %347 = dma.vmem_to_hbm [thread:$0]  %s342_s13, 256, %s610_s5, [#allocation4], %s539_s23, %s539_s23, %s540_s24  }
 0x1df   :  { %535 = dma.done.wait [#allocation4], 256  }
 0x1e0   :  { %536 = vsyncadd [#allocation4], 4294967040 }
 0x1e1   :  { %351 = vsyncpa [#allocation3], 1 }
 0x1e2   :  { %352 = vsyncpa [#allocation6], 1 }
 0x1e3   :  { %353 = vsyncpa [#allocation4], 1 }

</bundles_post_ra>
